<compile_context>
chip_gen: v7x
topology: tpu7x:2x2x1
jax: 0.10.0
libtpu: 0.0.40
codegen_flags: <defaults>
</compile_context>

<pallas_src>
import functools

import jax
import jax.numpy as jnp
import numpy as np
from jax import lax
from jax.experimental import pallas as pl
from jax.experimental.pallas import tpu as pltpu


def conv_layer_kernel(x_ref, w1_ref, b1_ref, w2_ref, b2_ref, o_ref,
                      col1_ref, y1_ref, col2_ref, y2_ref, *, K, W, L1, L2, LM):
    """One block of B lane-concatenated images per grid step.

    x_ref   : (Cin, B*S)        bf16   B input images back-to-back (stride S=H*W)
    w1_ref  : (Cout, K*K*Cin)   bf16   conv1 weights, col idx = (ki*K+kj)*Cin + ci
    b1_ref  : (Cout, 1)         f32
    w2_ref  : (Cout, K*K*Cout)  bf16   conv2 weights, same column ordering
    b2_ref  : (Cout, 1)         f32
    o_ref   : (1, Cout, LM)     f32    un-decimated 2x2-max slab (lane-dense store)
    col1_ref: (K*K*Cin, L1)     bf16   scratch: conv1 im2col
    y1_ref  : (Cout, L1)        bf16   scratch: conv1+ReLU activations
    col2_ref: (K*K*Cout, L2)    bf16   scratch: conv2 im2col
    y2_ref  : (Cout, L2)        bf16   scratch: conv2+ReLU activations
    """
    Cin = x_ref.shape[0]
    Cout = w1_ref.shape[0]

    # ---- conv1: on-the-fly im2col (K*K shifted slab copies) + ONE matmul ----
    for ki in range(K):
        for kj in range(K):
            t = ki * K + kj
            col1_ref[pl.ds(t * Cin, Cin), :] = x_ref[:, pl.ds(ki * W + kj, L1)]
    acc1 = jnp.dot(w1_ref[...], col1_ref[...],
                   preferred_element_type=jnp.float32)        # (Cout, L1) f32
    y1_ref[...] = jnp.maximum(acc1 + b1_ref[...], 0.0).astype(y1_ref.dtype)

    # ---- conv2: same trick, contraction depth K*K*Cout -----------------------
    for ki in range(K):
        for kj in range(K):
            t = ki * K + kj
            col2_ref[pl.ds(t * Cout, Cout), :] = y1_ref[:, pl.ds(ki * W + kj, L2)]
    acc2 = jnp.dot(w2_ref[...], col2_ref[...],
                   preferred_element_type=jnp.float32)        # (Cout, L2) f32
    y2_ref[...] = jnp.maximum(acc2 + b2_ref[...], 0.0).astype(y2_ref.dtype)

    # ---- MaxPool2d(2): 3 whole-slab VPU maxes, single lane-dense store -------
    # m4[c, r] = max of the 2x2 window whose flat top-left index is r.
    # The stride-2 decimation (keep r = 2i*W + 2j) is done in the wrapper;
    # garbage columns (wrapped rows / cross-image overlap) are never read there.
    m4 = jnp.maximum(
        jnp.maximum(y2_ref[:, pl.ds(0, LM)], y2_ref[:, pl.ds(1, LM)]),
        jnp.maximum(y2_ref[:, pl.ds(W, LM)], y2_ref[:, pl.ds(W + 1, LM)]))
    o_ref[0] = m4.astype(o_ref.dtype)

    # Dropout2d is the identity in eval mode (PyTorch inference semantics).
    # TODO(synk): training-mode Dropout2d (per-channel Bernoulli + 1/(1-p) scale)
    # would need pltpu.prng_seed / pltpu.prng_random_bits.


def _pick_images_per_step(N, S, target=16):
    """Largest divisor of N (<= target) whose lane width B*S is legal for a
    tiled BlockSpec, preferring >= 2 grid steps so v7x's two TCs both work."""
    best = N
    for B in range(min(N, target), 0, -1):
        if N % B == 0 and (B == N or (B * S) % 128 == 0):
            best = B
            break
    if N // best < 2:
        for B in range(best - 1, 0, -1):
            if N % B == 0 and (B * S) % 128 == 0:
                best = B
                break
    return best


def conv_layer_forward(x_nchw, w1_oihw, b1, w2_oihw, b2,
                       compute_dtype=jnp.bfloat16):
    """NCHW in / NCHW out; conv+ReLU+conv+ReLU+maxpool run inside the kernel."""
    N, Cin, H, W = x_nchw.shape
    Cout, _, K, _ = w1_oihw.shape
    H1, W1 = H - K + 1, W - K + 1            # conv1 "valid"
    H2, W2 = H1 - K + 1, W1 - K + 1          # conv2 "valid"
    Hp, Wp = H2 // 2, W2 // 2                # maxpool(2), floor

    S = H * W                                # per-image flat slab stride
    B = _pick_images_per_step(N, S)          # images per grid step
    num_steps = N // B
    max_shift = (K - 1) * W + (K - 1)
    L1 = B * S - max_shift                   # conv1 activation slab width
    L2 = L1 - max_shift                      # conv2 activation slab width
    LM = L2 - (W + 1)                        # 2x2-max slab width (all pool top-lefts)

    # Channels on sublanes, batch*spatial flattened on lanes; bf16 for the MXU.
    xf = jnp.transpose(x_nchw.reshape(N, Cin, S), (1, 0, 2)).reshape(Cin, N * S)
    xf = xf.astype(compute_dtype)

    # im2col weight layout: column index (ki*K + kj)*C + c.
    w1m = jnp.transpose(w1_oihw, (0, 2, 3, 1)).reshape(Cout, K * K * Cin)
    w2m = jnp.transpose(w2_oihw, (0, 2, 3, 1)).reshape(Cout, K * K * Cout)
    w1m = w1m.astype(compute_dtype)
    w2m = w2m.astype(compute_dtype)
    b1r = b1.reshape(Cout, 1).astype(jnp.float32)
    b2r = b2.reshape(Cout, 1).astype(jnp.float32)

    kernel = functools.partial(conv_layer_kernel, K=K, W=W, L1=L1, L2=L2, LM=LM)

    m4 = pl.pallas_call(
        kernel,
        out_shape=jax.ShapeDtypeStruct((num_steps, Cout, LM), jnp.float32),
        grid=(num_steps,),
        in_specs=[
            pl.BlockSpec((Cin, B * S), lambda n: (0, n)),
            pl.BlockSpec((Cout, K * K * Cin), lambda n: (0, 0)),
            pl.BlockSpec((Cout, 1), lambda n: (0, 0)),
            pl.BlockSpec((Cout, K * K * Cout), lambda n: (0, 0)),
            pl.BlockSpec((Cout, 1), lambda n: (0, 0)),
        ],
        out_specs=pl.BlockSpec((1, Cout, LM), lambda n: (n, 0, 0)),
        scratch_shapes=[
            pltpu.VMEM((K * K * Cin, L1), compute_dtype),   # conv1 im2col
            pltpu.VMEM((Cout, L1), compute_dtype),          # conv1+ReLU acts
            pltpu.VMEM((K * K * Cout, L2), compute_dtype),  # conv2 im2col
            pltpu.VMEM((Cout, L2), compute_dtype),          # conv2+ReLU acts
        ],
        compiler_params=pltpu.CompilerParams(
            dimension_semantics=("parallel",)),
    )(xf, w1m, b1r, w2m, b2r)

    # Stride-2 decimation of the 2x2-max slab + batch unpack (cheap wrapper gather).
    cols = (np.arange(B)[:, None, None] * S
            + 2 * W * np.arange(Hp)[None, :, None]
            + 2 * np.arange(Wp)[None, None, :]).reshape(-1).astype(np.int32)
    pooled = jnp.take(m4, jnp.asarray(cols), axis=2)        # (steps, Cout, B*Hp*Wp)
    pooled = pooled.reshape(num_steps, Cout, B, Hp, Wp)
    pooled = jnp.transpose(pooled, (0, 2, 1, 3, 4)).reshape(N, Cout, Hp, Wp)
    return pooled


def reference_forward(x_nchw, w1_oihw, b1, w2_oihw, b2):
    """Pure-JAX (XLA, f32) reference, eval mode (dropout = identity)."""
    dn = ("NCHW", "OIHW", "NCHW")
    y = lax.conv_general_dilated(x_nchw, w1_oihw, (1, 1), "VALID",
                                 dimension_numbers=dn)
    y = jnp.maximum(y + b1[None, :, None, None], 0.0)
    y = lax.conv_general_dilated(y, w2_oihw, (1, 1), "VALID",
                                 dimension_numbers=dn)
    y = jnp.maximum(y + b2[None, :, None, None], 0.0)
    y = lax.reduce_window(y, -jnp.inf, lax.max,
                          (1, 1, 2, 2), (1, 1, 2, 2), "VALID")
    return y


if __name__ == "__main__":
    # Small shapes consistent with the module: ConvLayer(in_c=4, out_c=8, K=3)
    N, in_c, out_c, K, H, W = 2, 4, 8, 3, 16, 16

    key = jax.random.PRNGKey(0)
    kx, kw1, kb1, kw2, kb2 = jax.random.split(key, 5)

    x = jax.random.normal(kx, (N, in_c, H, W), dtype=jnp.float32)

    # Deterministic PyTorch-like init: U(-1/sqrt(fan_in), 1/sqrt(fan_in))
    bound1 = 1.0 / np.sqrt(in_c * K * K)
    bound2 = 1.0 / np.sqrt(out_c * K * K)
    w1 = jax.random.uniform(kw1, (out_c, in_c, K, K), jnp.float32,
                            -bound1, bound1)
    b1 = jax.random.uniform(kb1, (out_c,), jnp.float32, -bound1, bound1)
    w2 = jax.random.uniform(kw2, (out_c, out_c, K, K), jnp.float32,
                            -bound2, bound2)
    b2 = jax.random.uniform(kb2, (out_c,), jnp.float32, -bound2, bound2)

    out = jax.block_until_ready(conv_layer_forward(x, w1, b1, w2, b2))
    ref = jax.block_until_ready(reference_forward(x, w1, b1, w2, b2))

    Hp = (H - 2 * (K - 1)) // 2
    Wp = (W - 2 * (K - 1)) // 2
    assert out.shape == (N, out_c, Hp, Wp), out.shape
    # bf16 matmul path -> loosened tolerance vs. the f32 XLA reference.
    np.testing.assert_allclose(np.asarray(out), np.asarray(ref),
                               rtol=2e-2, atol=2e-2)
    print("KERNEL_OK")
</pallas_src>

<mosaic_0001>
module attributes {stable_mosaic.version = 11 : i64} {
  func.func @conv_layer_kernel(%arg0: i32, %arg1: memref<4x256xbf16, #tpu.memory_space<vmem>>, %arg2: memref<8x36xbf16, #tpu.memory_space<vmem>>, %arg3: memref<8x1xf32, #tpu.memory_space<vmem>>, %arg4: memref<8x72xbf16, #tpu.memory_space<vmem>>, %arg5: memref<8x1xf32, #tpu.memory_space<vmem>>, %arg6: memref<1x8x171xf32, #tpu.memory_space<vmem>>, %arg7: memref<36x222xbf16, #tpu.memory_space<vmem>>, %arg8: memref<8x222xbf16, #tpu.memory_space<vmem>>, %arg9: memref<72x188xbf16, #tpu.memory_space<vmem>>, %arg10: memref<8x188xbf16, #tpu.memory_space<vmem>>) attributes {dimension_semantics = [#tpu.dimension_semantics<parallel>], iteration_bounds = array<i64: 2>, scalar_prefetch = 0 : i64, scratch_operands = 4 : i64, tpu.core_type = #tpu.core_type<tc>, window_params = [{transform_indices = @transform_0, window_bounds = array<i64: 4, 256>}, {pipeline_mode = #tpu.pipeline_mode<synchronous>, transform_indices = @transform_1, window_bounds = array<i64: 8, 36>}, {pipeline_mode = #tpu.pipeline_mode<synchronous>, transform_indices = @transform_2, window_bounds = array<i64: 8, 1>}, {pipeline_mode = #tpu.pipeline_mode<synchronous>, transform_indices = @transform_3, window_bounds = array<i64: 8, 72>}, {pipeline_mode = #tpu.pipeline_mode<synchronous>, transform_indices = @transform_4, window_bounds = array<i64: 8, 1>}, {transform_indices = @transform_5, window_bounds = array<i64: 1, 8, 171>}]} {
    %c0 = arith.constant 0 : index
    %c0_0 = arith.constant 0 : index
    %0 = vector.load %arg1[%c0, %c0_0] : memref<4x256xbf16, #tpu.memory_space<vmem>>, vector<4x222xbf16>
    %c0_1 = arith.constant 0 : index
    %c0_2 = arith.constant 0 : index
    %1 = vector.load %arg7[%c0_1, %c0_2] : memref<36x222xbf16, #tpu.memory_space<vmem>>, vector<4x222xbf16>
    tpu.vector_store %arg7[%c0_1, %c0_2], %0 {strides = array<i32>} : memref<36x222xbf16, #tpu.memory_space<vmem>>, vector<4x222xbf16>,
    %c0_3 = arith.constant 0 : index
    %c1 = arith.constant 1 : index
    %2 = vector.load %arg1[%c0_3, %c1] : memref<4x256xbf16, #tpu.memory_space<vmem>>, vector<4x222xbf16>
    %c4 = arith.constant 4 : index
    %c0_4 = arith.constant 0 : index
    %3 = vector.load %arg7[%c4, %c0_4] : memref<36x222xbf16, #tpu.memory_space<vmem>>, vector<4x222xbf16>
    tpu.vector_store %arg7[%c4, %c0_4], %2 {strides = array<i32>} : memref<36x222xbf16, #tpu.memory_space<vmem>>, vector<4x222xbf16>,
    %c0_5 = arith.constant 0 : index
    %c2 = arith.constant 2 : index
    %4 = vector.load %arg1[%c0_5, %c2] : memref<4x256xbf16, #tpu.memory_space<vmem>>, vector<4x222xbf16>
    %c8 = arith.constant 8 : index
    %c0_6 = arith.constant 0 : index
    %5 = vector.load %arg7[%c8, %c0_6] : memref<36x222xbf16, #tpu.memory_space<vmem>>, vector<4x222xbf16>
    tpu.vector_store %arg7[%c8, %c0_6], %4 {strides = array<i32>} : memref<36x222xbf16, #tpu.memory_space<vmem>>, vector<4x222xbf16>,
    %c0_7 = arith.constant 0 : index
    %c16 = arith.constant 16 : index
    %6 = vector.load %arg1[%c0_7, %c16] : memref<4x256xbf16, #tpu.memory_space<vmem>>, vector<4x222xbf16>
    %c12 = arith.constant 12 : index
    %c0_8 = arith.constant 0 : index
    %7 = vector.load %arg7[%c12, %c0_8] : memref<36x222xbf16, #tpu.memory_space<vmem>>, vector<4x222xbf16>
    tpu.vector_store %arg7[%c12, %c0_8], %6 {strides = array<i32>} : memref<36x222xbf16, #tpu.memory_space<vmem>>, vector<4x222xbf16>,
    %c0_9 = arith.constant 0 : index
    %c17 = arith.constant 17 : index
    %8 = vector.load %arg1[%c0_9, %c17] : memref<4x256xbf16, #tpu.memory_space<vmem>>, vector<4x222xbf16>
    %c16_10 = arith.constant 16 : index
    %c0_11 = arith.constant 0 : index
    %9 = vector.load %arg7[%c16_10, %c0_11] : memref<36x222xbf16, #tpu.memory_space<vmem>>, vector<4x222xbf16>
    tpu.vector_store %arg7[%c16_10, %c0_11], %8 {strides = array<i32>} : memref<36x222xbf16, #tpu.memory_space<vmem>>, vector<4x222xbf16>,
    %c0_12 = arith.constant 0 : index
    %c18 = arith.constant 18 : index
    %10 = vector.load %arg1[%c0_12, %c18] : memref<4x256xbf16, #tpu.memory_space<vmem>>, vector<4x222xbf16>
    %c20 = arith.constant 20 : index
    %c0_13 = arith.constant 0 : index
    %11 = vector.load %arg7[%c20, %c0_13] : memref<36x222xbf16, #tpu.memory_space<vmem>>, vector<4x222xbf16>
    tpu.vector_store %arg7[%c20, %c0_13], %10 {strides = array<i32>} : memref<36x222xbf16, #tpu.memory_space<vmem>>, vector<4x222xbf16>,
    %c0_14 = arith.constant 0 : index
    %c32 = arith.constant 32 : index
    %12 = vector.load %arg1[%c0_14, %c32] : memref<4x256xbf16, #tpu.memory_space<vmem>>, vector<4x222xbf16>
    %c24 = arith.constant 24 : index
    %c0_15 = arith.constant 0 : index
    %13 = vector.load %arg7[%c24, %c0_15] : memref<36x222xbf16, #tpu.memory_space<vmem>>, vector<4x222xbf16>
    tpu.vector_store %arg7[%c24, %c0_15], %12 {strides = array<i32>} : memref<36x222xbf16, #tpu.memory_space<vmem>>, vector<4x222xbf16>,
    %c0_16 = arith.constant 0 : index
    %c33 = arith.constant 33 : index
    %14 = vector.load %arg1[%c0_16, %c33] : memref<4x256xbf16, #tpu.memory_space<vmem>>, vector<4x222xbf16>
    %c28 = arith.constant 28 : index
    %c0_17 = arith.constant 0 : index
    %15 = vector.load %arg7[%c28, %c0_17] : memref<36x222xbf16, #tpu.memory_space<vmem>>, vector<4x222xbf16>
    tpu.vector_store %arg7[%c28, %c0_17], %14 {strides = array<i32>} : memref<36x222xbf16, #tpu.memory_space<vmem>>, vector<4x222xbf16>,
    %c0_18 = arith.constant 0 : index
    %c34 = arith.constant 34 : index
    %16 = vector.load %arg1[%c0_18, %c34] : memref<4x256xbf16, #tpu.memory_space<vmem>>, vector<4x222xbf16>
    %c32_19 = arith.constant 32 : index
    %c0_20 = arith.constant 0 : index
    %17 = vector.load %arg7[%c32_19, %c0_20] : memref<36x222xbf16, #tpu.memory_space<vmem>>, vector<4x222xbf16>
    tpu.vector_store %arg7[%c32_19, %c0_20], %16 {strides = array<i32>} : memref<36x222xbf16, #tpu.memory_space<vmem>>, vector<4x222xbf16>,
    %c0_21 = arith.constant 0 : index
    %c0_22 = arith.constant 0 : index
    %18 = vector.load %arg2[%c0_21, %c0_22] : memref<8x36xbf16, #tpu.memory_space<vmem>>, vector<8x36xbf16>
    %c0_23 = arith.constant 0 : index
    %c0_24 = arith.constant 0 : index
    %19 = vector.load %arg7[%c0_23, %c0_24] : memref<36x222xbf16, #tpu.memory_space<vmem>>, vector<36x222xbf16>
    %cst = arith.constant dense<0.000000e+00> : vector<8x222xf32>
    %20 = tpu.matmul %18, %19, %cst {dimension_numbers = #tpu.dot_dimension_numbers<[1], [0], [0], [1], [0, 0, 1, 1], [], []>} : vector<8x36xbf16>, vector<36x222xbf16>, vector<8x222xf32> -> vector<8x222xf32>
    %c0_25 = arith.constant 0 : index
    %c0_26 = arith.constant 0 : index
    %21 = vector.load %arg3[%c0_25, %c0_26] : memref<8x1xf32, #tpu.memory_space<vmem>>, vector<8x1xf32>
    %22 = vector.broadcast %21 : vector<8x1xf32> to vector<8x222xf32>
    %23 = arith.addf %20, %22 : vector<8x222xf32>
    %cst_27 = arith.constant 0.000000e+00 : f32
    %24 = vector.broadcast %cst_27 : f32 to vector<8x222xf32>
    %25 = arith.maximumf %23, %24 : vector<8x222xf32>
    %26 = arith.truncf %25 : vector<8x222xf32> to vector<8x222xbf16>
    %c0_28 = arith.constant 0 : index
    %c0_29 = arith.constant 0 : index
    %27 = vector.load %arg8[%c0_28, %c0_29] : memref<8x222xbf16, #tpu.memory_space<vmem>>, vector<8x222xbf16>
    tpu.vector_store %arg8[%c0_28, %c0_29], %26 {strides = array<i32>} : memref<8x222xbf16, #tpu.memory_space<vmem>>, vector<8x222xbf16>,
    %c0_30 = arith.constant 0 : index
    %c0_31 = arith.constant 0 : index
    %28 = vector.load %arg8[%c0_30, %c0_31] : memref<8x222xbf16, #tpu.memory_space<vmem>>, vector<8x188xbf16>
    %c0_32 = arith.constant 0 : index
    %c0_33 = arith.constant 0 : index
    %29 = vector.load %arg9[%c0_32, %c0_33] : memref<72x188xbf16, #tpu.memory_space<vmem>>, vector<8x188xbf16>
    tpu.vector_store %arg9[%c0_32, %c0_33], %28 {strides = array<i32>} : memref<72x188xbf16, #tpu.memory_space<vmem>>, vector<8x188xbf16>,
    %c0_34 = arith.constant 0 : index
    %c1_35 = arith.constant 1 : index
    %30 = vector.load %arg8[%c0_34, %c1_35] : memref<8x222xbf16, #tpu.memory_space<vmem>>, vector<8x188xbf16>
    %c8_36 = arith.constant 8 : index
    %c0_37 = arith.constant 0 : index
    %31 = vector.load %arg9[%c8_36, %c0_37] : memref<72x188xbf16, #tpu.memory_space<vmem>>, vector<8x188xbf16>
    tpu.vector_store %arg9[%c8_36, %c0_37], %30 {strides = array<i32>} : memref<72x188xbf16, #tpu.memory_space<vmem>>, vector<8x188xbf16>,
    %c0_38 = arith.constant 0 : index
    %c2_39 = arith.constant 2 : index
    %32 = vector.load %arg8[%c0_38, %c2_39] : memref<8x222xbf16, #tpu.memory_space<vmem>>, vector<8x188xbf16>
    %c16_40 = arith.constant 16 : index
    %c0_41 = arith.constant 0 : index
    %33 = vector.load %arg9[%c16_40, %c0_41] : memref<72x188xbf16, #tpu.memory_space<vmem>>, vector<8x188xbf16>
    tpu.vector_store %arg9[%c16_40, %c0_41], %32 {strides = array<i32>} : memref<72x188xbf16, #tpu.memory_space<vmem>>, vector<8x188xbf16>,
    %c0_42 = arith.constant 0 : index
    %c16_43 = arith.constant 16 : index
    %34 = vector.load %arg8[%c0_42, %c16_43] : memref<8x222xbf16, #tpu.memory_space<vmem>>, vector<8x188xbf16>
    %c24_44 = arith.constant 24 : index
    %c0_45 = arith.constant 0 : index
    %35 = vector.load %arg9[%c24_44, %c0_45] : memref<72x188xbf16, #tpu.memory_space<vmem>>, vector<8x188xbf16>
    tpu.vector_store %arg9[%c24_44, %c0_45], %34 {strides = array<i32>} : memref<72x188xbf16, #tpu.memory_space<vmem>>, vector<8x188xbf16>,
    %c0_46 = arith.constant 0 : index
    %c17_47 = arith.constant 17 : index
    %36 = vector.load %arg8[%c0_46, %c17_47] : memref<8x222xbf16, #tpu.memory_space<vmem>>, vector<8x188xbf16>
    %c32_48 = arith.constant 32 : index
    %c0_49 = arith.constant 0 : index
    %37 = vector.load %arg9[%c32_48, %c0_49] : memref<72x188xbf16, #tpu.memory_space<vmem>>, vector<8x188xbf16>
    tpu.vector_store %arg9[%c32_48, %c0_49], %36 {strides = array<i32>} : memref<72x188xbf16, #tpu.memory_space<vmem>>, vector<8x188xbf16>,
    %c0_50 = arith.constant 0 : index
    %c18_51 = arith.constant 18 : index
    %38 = vector.load %arg8[%c0_50, %c18_51] : memref<8x222xbf16, #tpu.memory_space<vmem>>, vector<8x188xbf16>
    %c40 = arith.constant 40 : index
    %c0_52 = arith.constant 0 : index
    %39 = vector.load %arg9[%c40, %c0_52] : memref<72x188xbf16, #tpu.memory_space<vmem>>, vector<8x188xbf16>
    tpu.vector_store %arg9[%c40, %c0_52], %38 {strides = array<i32>} : memref<72x188xbf16, #tpu.memory_space<vmem>>, vector<8x188xbf16>,
    %c0_53 = arith.constant 0 : index
    %c32_54 = arith.constant 32 : index
    %40 = vector.load %arg8[%c0_53, %c32_54] : memref<8x222xbf16, #tpu.memory_space<vmem>>, vector<8x188xbf16>
    %c48 = arith.constant 48 : index
    %c0_55 = arith.constant 0 : index
    %41 = vector.load %arg9[%c48, %c0_55] : memref<72x188xbf16, #tpu.memory_space<vmem>>, vector<8x188xbf16>
    tpu.vector_store %arg9[%c48, %c0_55], %40 {strides = array<i32>} : memref<72x188xbf16, #tpu.memory_space<vmem>>, vector<8x188xbf16>,
    %c0_56 = arith.constant 0 : index
    %c33_57 = arith.constant 33 : index
    %42 = vector.load %arg8[%c0_56, %c33_57] : memref<8x222xbf16, #tpu.memory_space<vmem>>, vector<8x188xbf16>
    %c56 = arith.constant 56 : index
    %c0_58 = arith.constant 0 : index
    %43 = vector.load %arg9[%c56, %c0_58] : memref<72x188xbf16, #tpu.memory_space<vmem>>, vector<8x188xbf16>
    tpu.vector_store %arg9[%c56, %c0_58], %42 {strides = array<i32>} : memref<72x188xbf16, #tpu.memory_space<vmem>>, vector<8x188xbf16>,
    %c0_59 = arith.constant 0 : index
    %c34_60 = arith.constant 34 : index
    %44 = vector.load %arg8[%c0_59, %c34_60] : memref<8x222xbf16, #tpu.memory_space<vmem>>, vector<8x188xbf16>
    %c64 = arith.constant 64 : index
    %c0_61 = arith.constant 0 : index
    %45 = vector.load %arg9[%c64, %c0_61] : memref<72x188xbf16, #tpu.memory_space<vmem>>, vector<8x188xbf16>
    tpu.vector_store %arg9[%c64, %c0_61], %44 {strides = array<i32>} : memref<72x188xbf16, #tpu.memory_space<vmem>>, vector<8x188xbf16>,
    %c0_62 = arith.constant 0 : index
    %c0_63 = arith.constant 0 : index
    %46 = vector.load %arg4[%c0_62, %c0_63] : memref<8x72xbf16, #tpu.memory_space<vmem>>, vector<8x72xbf16>
    %c0_64 = arith.constant 0 : index
    %c0_65 = arith.constant 0 : index
    %47 = vector.load %arg9[%c0_64, %c0_65] : memref<72x188xbf16, #tpu.memory_space<vmem>>, vector<72x188xbf16>
    %cst_66 = arith.constant dense<0.000000e+00> : vector<8x188xf32>
    %48 = tpu.matmul %46, %47, %cst_66 {dimension_numbers = #tpu.dot_dimension_numbers<[1], [0], [0], [1], [0, 0, 1, 1], [], []>} : vector<8x72xbf16>, vector<72x188xbf16>, vector<8x188xf32> -> vector<8x188xf32>
    %c0_67 = arith.constant 0 : index
    %c0_68 = arith.constant 0 : index
    %49 = vector.load %arg5[%c0_67, %c0_68] : memref<8x1xf32, #tpu.memory_space<vmem>>, vector<8x1xf32>
    %50 = vector.broadcast %49 : vector<8x1xf32> to vector<8x188xf32>
    %51 = arith.addf %48, %50 : vector<8x188xf32>
    %cst_69 = arith.constant 0.000000e+00 : f32
    %52 = vector.broadcast %cst_69 : f32 to vector<8x188xf32>
    %53 = arith.maximumf %51, %52 : vector<8x188xf32>
    %54 = arith.truncf %53 : vector<8x188xf32> to vector<8x188xbf16>
    %c0_70 = arith.constant 0 : index
    %c0_71 = arith.constant 0 : index
    %55 = vector.load %arg10[%c0_70, %c0_71] : memref<8x188xbf16, #tpu.memory_space<vmem>>, vector<8x188xbf16>
    tpu.vector_store %arg10[%c0_70, %c0_71], %54 {strides = array<i32>} : memref<8x188xbf16, #tpu.memory_space<vmem>>, vector<8x188xbf16>,
    %c0_72 = arith.constant 0 : index
    %c0_73 = arith.constant 0 : index
    %56 = vector.load %arg10[%c0_72, %c0_73] : memref<8x188xbf16, #tpu.memory_space<vmem>>, vector<8x171xbf16>
    %c0_74 = arith.constant 0 : index
    %c1_75 = arith.constant 1 : index
    %57 = vector.load %arg10[%c0_74, %c1_75] : memref<8x188xbf16, #tpu.memory_space<vmem>>, vector<8x171xbf16>
    %58 = arith.maximumf %56, %57 : vector<8x171xbf16>
    %c0_76 = arith.constant 0 : index
    %c16_77 = arith.constant 16 : index
    %59 = vector.load %arg10[%c0_76, %c16_77] : memref<8x188xbf16, #tpu.memory_space<vmem>>, vector<8x171xbf16>
    %c0_78 = arith.constant 0 : index
    %c17_79 = arith.constant 17 : index
    %60 = vector.load %arg10[%c0_78, %c17_79] : memref<8x188xbf16, #tpu.memory_space<vmem>>, vector<8x171xbf16>
    %61 = arith.maximumf %59, %60 : vector<8x171xbf16>
    %62 = arith.maximumf %58, %61 : vector<8x171xbf16>
    %63 = arith.extf %62 : vector<8x171xbf16> to vector<8x171xf32>
    %c0_80 = arith.constant 0 : index
    %c0_81 = arith.constant 0 : index
    %c0_82 = arith.constant 0 : index
    %64 = vector.load %arg6[%c0_80, %c0_81, %c0_82] : memref<1x8x171xf32, #tpu.memory_space<vmem>>, vector<1x8x171xf32>
    %65 = vector.shape_cast %64 : vector<1x8x171xf32> to vector<8x171xf32>
    %66 = vector.shape_cast %63 : vector<8x171xf32> to vector<1x8x171xf32>
    tpu.vector_store %arg6[%c0_80, %c0_81, %c0_82], %66 {strides = array<i32>} : memref<1x8x171xf32, #tpu.memory_space<vmem>>, vector<1x8x171xf32>,
    return
  }
  func.func @transform_0(%arg0: i32) -> (i32, i32) {
    %c0_i32 = arith.constant 0 : i32
    %c0_i32_0 = arith.constant 0 : i32
    return %c0_i32, %arg0 : i32, i32
  }
  func.func @transform_1(%arg0: i32) -> (i32, i32) {
    %c0_i32 = arith.constant 0 : i32
    %c0_i32_0 = arith.constant 0 : i32
    %c0_i32_1 = arith.constant 0 : i32
    return %c0_i32, %c0_i32_0 : i32, i32
  }
  func.func @transform_2(%arg0: i32) -> (i32, i32) {
    %c0_i32 = arith.constant 0 : i32
    %c0_i32_0 = arith.constant 0 : i32
    %c0_i32_1 = arith.constant 0 : i32
    return %c0_i32, %c0_i32_0 : i32, i32
  }
  func.func @transform_3(%arg0: i32) -> (i32, i32) {
    %c0_i32 = arith.constant 0 : i32
    %c0_i32_0 = arith.constant 0 : i32
    %c0_i32_1 = arith.constant 0 : i32
    return %c0_i32, %c0_i32_0 : i32, i32
  }
  func.func @transform_4(%arg0: i32) -> (i32, i32) {
    %c0_i32 = arith.constant 0 : i32
    %c0_i32_0 = arith.constant 0 : i32
    %c0_i32_1 = arith.constant 0 : i32
    return %c0_i32, %c0_i32_0 : i32, i32
  }
  func.func @transform_5(%arg0: i32) -> (i32, i32, i32) {
    %c0_i32 = arith.constant 0 : i32
    %c0_i32_0 = arith.constant 0 : i32
    %c0_i32_1 = arith.constant 0 : i32
    return %arg0, %c0_i32, %c0_i32_0 : i32, i32, i32
  }
}

</mosaic_0001>

<bundles_post_ra>
// kernel: tpu_custom_call.1
= control target key start
LH: loop header
LB: loop body
LE: loop exit
PB: predicated region body
PF: predicated region fallthrough
CT: control target
= control target key end

     0   :  { %10 = vsyncpa [#allocation7], 0  ;;  %s1189_s0 = inlined_call_operand.vmem [shape: bf16[4,512], index: 0, kind: input, shape index: {}]   ;;  %s1190_s1 = inlined_call_operand.vmem [shape: bf16[8,36], index: 1, kind: input, shape index: {}]   ;;  %s1191_s2 = inlined_call_operand.vmem [shape: f32[8,1], index: 2, kind: input, shape index: {}]   ;;  %s1192_s3 = inlined_call_operand.vmem [shape: bf16[8,72], index: 3, kind: input, shape index: {}]   ;;  %s1193_s4 = inlined_call_operand.vmem [shape: f32[8,1], index: 4, kind: input, shape index: {}]   ;;  %s1194_s5 = inlined_call_operand.hbm [shape: f32[2,8,171], index: 5, kind: output, shape index: {}]  }
   0x1   :  { %12 = vsyncpa [#allocation7 + $0x1], 0  ;;  %s985_s18 = smov 0   ;;  %s987_s19 = smov 0  }
   0x2   :  { %s989_s20 = smov 0   ;;  %s991_s21 = smov 0  }
   0x3 LB: > { %s1006_s22 = sadd.s32 4294967295, %s942_s21   ;;  %s762_s23 = sadd.s32 4294967294, %s942_s21   ;;  %s942_s21 = sphi %s991_s21, %s1206_s21   ;;  %s938_s20 = sphi %s989_s20, %s1205_s20   ;;  %s934_s19 = sphi %s987_s19, %s1204_s19   ;;  %s930_s18 = sphi %s985_s18, %s1203_s18  }
   0x4   : > { %s1010_s24 = sadd.s32 1, %s942_s21   ;;  %s135_s25 = sadd.s32 1, %s938_s20 }
   0x5   : > { %s132_s26 = ssub.s32 %s942_s21, %s1010_s24  ;;  %p145_p0 = scmp.ne.s32.totalorder %s938_s20, %s934_s19 }
   0x6   : > { %p133_p1 = scmp.eq.s32.totalorder %s132_s26, 0  ;;  %p146_p2 = scmp.eq.s32.totalorder %s1006_s22, 1 }
   0x7   : > { %p151_p3 = scmp.ne.s32.totalorder %s934_s19, %s930_s18  ;;  %p152_p4 = scmp.eq.s32.totalorder %s762_s23, 1 }
   0x8   : > { %s1021_s27 = scalar_select %p133_p1, %s938_s20, %s135_s25  }
   0x9   : > { %p1023_p5 = por %p146_p2, %p145_p0  ;;  %p1027_p6 = por %p152_p4, %p151_p3 }
   0xa   : > { %p765_p7 = scmp.ge.s32.totalorder %s942_s21, 1  ;;  %p191_p8 = scmp.lt.s32.totalorder %s942_s21, 3 }
   0xc   : > { %p192_p9 = pnand %p765_p7, %p191_p8 }
   0xd   : > { %s767_s30 = sshll.u32 (!%p192_p9), %s1006_s22, 1  ;;  %v246_v0 = vlaneseq (!%p192_p9)  ;;  %v944_v1 = vmov (!%p192_p9), 1983009808   ;;  %vm236_vm0 = vcmask (!%p192_p9), 1041408   ;;  %vm237_vm1 = vcmask (!%p192_p9), 766980   ;;  %s945_s10 = smov (!%p192_p9), 111  }
   0xe   : > { %195 = sbr.rel (%p192_p9) target bundleno = 1030 (0x406), region = 40  ;;  %p220_p10 = scmp.lt.s32.totalorder (!%p192_p9), %s767_s30, 3  ;;  %v244_v2 = vunpack.c.l.s4 (!%p192_p9), %v944_v1  ;;  %vm1038_vm2 = vmor (!%p192_p9), %vm237_vm1, %vm236_vm0  ;;  %v953_v16 = vmov (!%p192_p9), 0   ;;  %v381_v17 = vld [vmem:[%s1191_s2] sm:$0xff] (!%p192_p9)  ;;  %vm305_vm3 = vcmask (!%p192_p9), 908288   ;;  %vm272_vm4 = vcmask (!%p192_p9), 1031168  }
   0xf   : > { %v247_v3 = vshrl.u32 (!%p192_p9), %v246_v0, 7  ;;  %s946_s11 = smov (!%p192_p9), 126   ;;  %s947_s12 = smov (!%p192_p9), 112   ;;  %454 = vmatprep.mubr.bf16.mxu0 (!%p192_p9), %v953_v16  ;;  %853 = vset.pattern.permute.xlu0 (!%p192_p9), %v953_v16  ;;  %vm256_vm5 = vcmask (!%p192_p9), 1043458   ;;  %vm257_vm6 = vcmask (!%p192_p9), 769030   ;;  %vm289_vm7 = vcmask (!%p192_p9), 916480  }
  0x10   : > { %v245_v4 = vunpack.c.0.s8 (!%p192_p9), %v244_v2  ;;  %s948_s13 = smov (!%p192_p9), 127   ;;  %s949_s14 = smov (!%p192_p9), 96   ;;  %648 = vmatprep.mubr.bf16.mxu1 (!%p192_p9), %v953_v16  ;;  %vm1061_vm8 = vmor (!%p192_p9), %vm257_vm6, %vm256_vm5  ;;  %vm253_vm9 = vcmask (!%p192_p9), 1039360   ;;  %vm338_vm10 = vcmask (!%p192_p9), 785408   ;;  %vm322_vm11 = vcmask (!%p192_p9), 900096   ;;  %v555_v0 = vld [vmem:[%s1193_s4] sm:$0xff] (!%p192_p9) }
  0x11   : > { %s950_s15 = smov (!%p192_p9), 110   ;;  %s951_s16 = smov (!%p192_p9), 94   ;;  %vm371_vm12 = vcmask (!%p192_p9), 769024   ;;  %vm355_vm13 = vcmask (!%p192_p9), 777216   ;;  %v375_v51 = vld [vmem:[%s1190_s1] sm:$0xf] (!%p192_p9) }
  0x12   : > { %v248_v5 = vsub.s32 (!%p192_p9), %v245_v4, %v247_v3  ;;  %s952_s17 = smov (!%p192_p9), 95   ;;  %vm412_vm14 = vcmask (!%p192_p9), 293888   ;;  %vm473_vm15 = vcmask (!%p192_p9), 1043456   ;;  %vm474_vm1 = vcmask (!%p192_p9), 769028   ;;  %s954_s25 = smov (!%p192_p9), [#allocation6]  }
  0x13   : > { %s884_s26 = sshll.u32 (!%p192_p9), %s954_s25, 4  ;;  %s885_s26 = int_to_ptr.vmem [resolvable:$false] %s884_s26 }
  0x15   : > { %s1208_s30 = smov (!%p220_p10, %s767_s30), 3 }
  0x16   : > { %s768_s6 = sshll.u32 %s1208_s30, 1  ;;  %s886_s30 = scalar_lea.vmem %s885_s26, 512 }
  0x17   : > { %s223_s9 = scalar_lea.vmem %s1189_s0, %s768_s6 }
  0x18   : > { %v771_v6 = vld.sshfl [vmem:[%s223_s9] sm:$0x33 pattern:$0x76325410] }
  0x19   : > { %302 = vrot.lane.b32.xlu1 %v771_v6, %s945_s10  ;;  %269 = vrot.lane.b32.xlu0 %v771_v6, %s946_s11  ;;  %v854_v8 = vld [vmem:[%s223_s9] ss:$0 sps:$4 sm:$0xff]   ;;  %239 = vst.msk [vmem:[#allocation2] sm:$0x33] %vm1038_vm2, %v771_v6 }
  0x1a   : > { %v855_v9 = vld [vmem:[%s223_s9] ss:$0 sps:$4 sm:$0xff]   ;;  %v285_v11 = vrot.slane %v854_v8, %v248_v5 }
  0x1b   : > { %v856_v10 = vld [vmem:[%s223_s9] ss:$0 sps:$4 sm:$0xff]   ;;  %v249_v12 = vrot.slane %v855_v9, %v248_v5 }
  0x1c   : > { %v318_v13 = vrot.slane %v856_v10, %v248_v5  ;;  %v857_v14 = vld [vmem:[%s223_s9] ss:$0 sps:$4 sm:$0xff]  }
  0x1d   : > { %286 = vrot.lane.b32.xlu1 %v285_v11, %s947_s12  ;;  %250 = vrot.lane.b32.xlu0 %v249_v12, %s948_s13  ;;  %v351_v15 = vrot.slane %v857_v14, %v248_v5 }
  0x21   : > { %335 = vrot.lane.b32.xlu1 %v771_v6, %s949_s14  ;;  %319 = vrot.lane.b32.xlu0 %v318_v13, %s950_s15 }
  0x25   : > { %368 = vrot.lane.b32.xlu1 %v771_v6, %s951_s16  ;;  %352 = vrot.lane.b32.xlu0 %v351_v15, %s952_s17 }
  0x29   : > { %384 = vperm.xlu0 %853, %v381_v17  }
  0x8b   : > { %v303_v18 = vpop.permute.xlu1 %302  ;;  %v270_v19 = vpop.permute.xlu0 %269 }
  0x8c   : > { %v304_v20 = vrot.slane %v303_v18, 4  ;;  %v271_v21 = vrot.slane %v270_v19, 4 }
  0x8e   : > { %v306_v22 = vsel %vm305_vm3, %v303_v18, %v304_v20  ;;  %v273_v23 = vsel %vm272_vm4, %v270_v19, %v271_v21 }
  0x8f   : > { %308 = vst.msk [vmem:[#allocation2 + $0x10] sm:$0x33] %vm1038_vm2, %v306_v22  ;;  %275 = vst.msk [vmem:[#allocation2 + $0x8] sm:$0x33] %vm1038_vm2, %v273_v23  ;;  %v287_v24 = vpop.permute.xlu1 %286  ;;  %v251_v27 = vpop.permute.xlu0 %250 }
  0x90   : > { %v288_v26 = vrot.slane %v287_v24, 4  ;;  %v252_v28 = vrot.slane %v251_v27, 4 }
  0x92   : > { %v290_v29 = vsel %vm289_vm7, %v287_v24, %v288_v26  ;;  %v254_v30 = vsel %vm253_vm9, %v251_v27, %v252_v28 }
  0x93   : > { %292 = vst.msk [vmem:[#allocation2 + $0x8] sm:$0xcc] %vm1061_vm8, %v290_v29  ;;  %v336_v31 = vpop.permute.xlu1 %335  ;;  %259 = vst.msk [vmem:[#allocation2] sm:$0xcc] %vm1061_vm8, %v254_v30  ;;  %v320_v32 = vpop.permute.xlu0 %319 }
  0x94   : > { %v337_v33 = vrot.slane %v336_v31, 4  ;;  %v321_v34 = vrot.slane %v320_v32, 4 }
  0x96   : > { %v339_v35 = vsel %vm338_vm10, %v336_v31, %v337_v33  ;;  %v323_v36 = vsel %vm322_vm11, %v320_v32, %v321_v34 }
  0x97   : > { %341 = vst.msk [vmem:[#allocation2 + $0x18] sm:$0x33] %vm1038_vm2, %v339_v35  ;;  %v369_v37 = vpop.permute.xlu1 %368  ;;  %v353_v38 = vpop.permute.xlu0 %352 }
  0x98   : > { %325 = vst.msk [vmem:[#allocation2 + $0x10] sm:$0xcc] %vm1061_vm8, %v323_v36  ;;  %v370_v39 = vrot.slane %v369_v37, 4  ;;  %v354_v40 = vrot.slane %v353_v38, 4 }
  0x9a   : > { %v372_v41 = vsel %vm371_vm12, %v369_v37, %v370_v39  ;;  %v356_v42 = vsel %vm355_vm13, %v353_v38, %v354_v40  ;;  %v858_v43 = vld [vmem:[#allocation2 + $0x4] ss:$8 sps:$4 sm:$0xff]   ;;  %v860_v44 = vld [vmem:[#allocation2] ss:$8 sps:$4 sm:$0xff]  }
  0x9b   : > { %374 = vst.msk [vmem:[#allocation2 + $0x20] sm:$0x33] %vm1038_vm2, %v372_v41  ;;  %422 = vmatprep.subr.bf16.mxu0 %v858_v43  ;;  %vm478_vm2 = vcmask 490500   ;;  %v545_v37 = vld [vmem:[%s1192_s3] sm:$0xf] }
  0x9c   : > { %358 = vst.msk [vmem:[#allocation2 + $0x18] sm:$0xcc] %vm1061_vm8, %v356_v42  ;;  %423 = vmatpush1.bf16.msra.mxu0 %v860_v44  ;;  %vm1090_vm5 = vmor %vm478_vm2, %vm473_vm15 }
  0xa2   : > { %v380_v45 = vld [vmem:[#allocation2 + $0x20] sm:$0x33] }
  0xa3   : > { %v861_v46 = vld [vmem:[#allocation2 + $0x14] ss:$8 sps:$4 sm:$0xff]   ;;  %v863_v47 = vld [vmem:[#allocation2 + $0x10] ss:$8 sps:$4 sm:$0xff]   ;;  %v779_v48 = vcombine.high %v380_v45, %v380_v45  ;;  %v778_v49 = vcombine.low %v380_v45, %v380_v45 }
  0xa4   : > { %424 = vmatprep.subr.bf16.mxu0 %v861_v46 }
  0xa5   : > { %425 = vmatpush1.bf16.msra.mxu0 %v863_v47  ;;  %v417_v50 = vsel %vm236_vm0, %v778_v49, 0 }
  0xa6   : > { %780 = vmatprep.subr.msk.bf16.mxu0 %vm236_vm0, %v779_v48  ;;  %vm475_vm0 = vmor %vm474_vm1, %vm473_vm15 }
  0xa8   : > { %v385_v52 = vpop.permute.xlu0 %384 }
  0xa9   : > { %427 = vmatpush1.bf16.msra.mxu0 %v417_v50 }
  0xac   : > { %781 = vmatmul.mubr.msk.bf16.vlgmr.msra.gmra.mrb[0].mxu0 %vm412_vm14, %v375_v51 }
 0x17f   : > { %v456_v53 = vpop.f32.mrb[0].mxu0 }
 0x180   : > { %v457_v54 = vadd.f32 %v456_v53, %v385_v52  ;;  %v458_v55 = vpop.f32.mrb[1].mxu0 }
 0x181   : > { %v459_v56 = vadd.f32 %v458_v55, %v385_v52  ;;  %v460_v57 = vpop.f32.mrb[2].mxu0 }
 0x182   : > { %v463_v58 = vmax.f32 %v457_v54, 0.0  ;;  %v461_v59 = vpop.f32.mrb[3].mxu0 }
 0x183   : > { %v464_v60 = vmax.f32 %v459_v56, 0.0 }
 0x185   : > { %v801_v61 = vpack.c.bf16 %v464_v60, %v463_v58 }
 0x187   : > { %476 = vst.msk [vmem:[#allocation3] sm:$0xff] %vm475_vm0, %v801_v61 }
 0x18e   : > { %v497_v63 = vld [vmem:[#allocation3] sm:$0xff] }
 0x18f   : > { %499 = vrot.lane.b32.xlu0 %v497_v63, %s947_s12  ;;  %483 = vrot.lane.b32.xlu1 %v497_v63, %s948_s13  ;;  %480 = vst.msk [vmem:[#allocation4] sm:$0xff] %vm1090_vm5, %v497_v63 }
 0x193   : > { %515 = vrot.lane.b32.xlu0 %v497_v63, %s950_s15  ;;  %491 = vrot.lane.b32.xlu1 %v497_v63, %s946_s11 }
 0x197   : > { %531 = vrot.lane.b32.xlu0 %v497_v63, %s952_s17  ;;  %507 = vrot.lane.b32.xlu1 %v497_v63, %s945_s10  ;;  %s216_s10 = sand.u32 1, %s934_s19  }
 0x198   : > { %s766_s11 = sshll.u32 %s216_s10, 4 }
 0x199   : > { %s218_s15 = scalar_lea.vmem [#allocation6], %s766_s11 }
 0x19b   : > { %558 = vperm.xlu0 %853, %v555_v0   ;;  %523 = vrot.lane.b32.xlu1 %v497_v63, %s949_s14  ;;  %s803_s14 = sshll.u32 %s1006_s22, 8 }
 0x19c   : > { %s1147_s23 = scalar_lea.hbm %s1194_s5, %s803_s14 }
 0x19f   : > { %539 = vrot.lane.b32.xlu1 %v497_v63, %s951_s16  ;;  %s703_s16 = sshll.u32 %s218_s15, 4  ;;  %s1149_s16 = int_to_ptr.vmem [resolvable:$true] %s703_s16 }
 0x1a0   : > { %s880_s22 = scalar_lea.vmem %s1149_s16, 256  ;;  %p887_p0 = scmp.lt.s32.totalorder %s1149_s16, %s885_s26 }
 0x1a1   : > { %p881_p11 = scmp.ne.s32.totalorder %s1149_s16, %s880_s22  ;;  %p888_p1 = scmp.lt.s32.totalorder %s886_s30, %s880_s22 }
 0x1a3   : > { %p882_p12 = pnand %p881_p11, %p1023_p5  ;;  %p889_p2 = por %p888_p1, %p887_p0 }
 0x1a5   : > { %p883_p13 = pneg %p882_p12 }
 0x1a7   : > { %p890_p3 = pnand %p889_p2, %p883_p13 }
 0x201   : > { %v500_v1 = vpop.permute.xlu0 %499  ;;  %v484_v2 = vpop.permute.xlu1 %483 }
 0x202   : > { %v501_v3 = vrot.slane %v500_v1, 4  ;;  %v485_v4 = vrot.slane %v484_v2, 4 }
 0x204   : > { %v502_v5 = vsel %vm289_vm7, %v500_v1, %v501_v3  ;;  %v486_v6 = vsel %vm253_vm9, %v484_v2, %v485_v4 }
 0x205   : > { %504 = vst.msk [vmem:[#allocation4 + $0x18] sm:$0xff] %vm1090_vm5, %v502_v5  ;;  %488 = vst.msk [vmem:[#allocation4 + $0x8] sm:$0xff] %vm1090_vm5, %v486_v6  ;;  %v516_v7 = vpop.permute.xlu0 %515  ;;  %v492_v8 = vpop.permute.xlu1 %491 }
 0x206   : > { %v517_v9 = vrot.slane %v516_v7, 4  ;;  %v493_v10 = vrot.slane %v492_v8, 4 }
 0x208   : > { %v518_v11 = vsel %vm322_vm11, %v516_v7, %v517_v9  ;;  %v494_v12 = vsel %vm272_vm4, %v492_v8, %v493_v10  ;;  %vm686_vm4 = vcmask 351232  }
 0x209   : > { %520 = vst.msk [vmem:[#allocation4 + $0x28] sm:$0xff] %vm1090_vm5, %v518_v11  ;;  %496 = vst.msk [vmem:[#allocation4 + $0x10] sm:$0xff] %vm1090_vm5, %v494_v12  ;;  %v532_v13 = vpop.permute.xlu0 %531  ;;  %v508_v14 = vpop.permute.xlu1 %507 }
 0x20a   : > { %v533_v15 = vrot.slane %v532_v13, 4  ;;  %v509_v16 = vrot.slane %v508_v14, 4 }
 0x20c   : > { %v534_v17 = vsel %vm355_vm13, %v532_v13, %v533_v15  ;;  %v510_v18 = vsel %vm305_vm3, %v508_v14, %v509_v16  ;;  %v866_v19 = vld [vmem:[#allocation4 + $0x4] ss:$8 sps:$4 sm:$0xff]   ;;  %v868_v20 = vld [vmem:[#allocation4] ss:$8 sps:$4 sm:$0xff]   ;;  %vm606_vm3 = vcmask 588800  }
 0x20d   : > { %536 = vst.msk [vmem:[#allocation4 + $0x38] sm:$0xff] %vm1090_vm5, %v534_v17  ;;  %512 = vst.msk [vmem:[#allocation4 + $0x20] sm:$0xff] %vm1090_vm5, %v510_v18  ;;  %v524_v21 = vpop.permute.xlu1 %523  ;;  %616 = vmatprep.subr.bf16.mxu1 %v866_v19 }
 0x20e   : > { %v525_v22 = vrot.slane %v524_v21, 4  ;;  %617 = vmatpush1.bf16.msra.mxu1 %v868_v20 }
 0x210   : > { %v526_v23 = vsel %vm338_vm10, %v524_v21, %v525_v22  ;;  %v869_v24 = vld [vmem:[#allocation4 + $0x14] ss:$8 sps:$4 sm:$0xff]   ;;  %v871_v25 = vld [vmem:[#allocation4 + $0x10] ss:$8 sps:$4 sm:$0xff]  }
 0x211   : > { %528 = vst.msk [vmem:[#allocation4 + $0x30] sm:$0xff] %vm1090_vm5, %v526_v23  ;;  %v540_v26 = vpop.permute.xlu1 %539  ;;  %618 = vmatprep.subr.bf16.mxu1 %v869_v24 }
 0x212   : > { %v541_v27 = vrot.slane %v540_v26, 4  ;;  %619 = vmatpush1.bf16.msra.mxu1 %v871_v25 }
 0x214   : > { %v542_v28 = vsel %vm371_vm12, %v540_v26, %v541_v27  ;;  %v872_v29 = vld [vmem:[#allocation4 + $0x24] ss:$8 sps:$4 sm:$0xff]   ;;  %v874_v30 = vld [vmem:[#allocation4 + $0x20] ss:$8 sps:$4 sm:$0xff]  }
 0x215   : > { %544 = vst.msk [vmem:[#allocation4 + $0x40] sm:$0xff] %vm1090_vm5, %v542_v28  ;;  %620 = vmatprep.subr.bf16.mxu1 %v872_v29 }
 0x216   : > { %621 = vmatpush1.bf16.msra.mxu1 %v874_v30 }
 0x218   : > { %v875_v31 = vld [vmem:[#allocation4 + $0x34] ss:$8 sps:$4 sm:$0xff]   ;;  %v877_v32 = vld [vmem:[#allocation4 + $0x30] ss:$8 sps:$4 sm:$0xff]  }
 0x219   : > { %622 = vmatprep.subr.bf16.mxu1 %v875_v31 }
 0x21a   : > { %623 = vmatpush1.bf16.msra.mxu1 %v877_v32  ;;  %v559_v38 = vpop.permute.xlu0 %558 }
 0x21c   : > { %v554_v33 = vld [vmem:[#allocation4 + $0x40] sm:$0xff] }
 0x21d   : > { %v792_v34 = vcombine.high %v554_v33, %v554_v33  ;;  %v791_v35 = vcombine.low %v554_v33, %v554_v33 }
 0x21f   : > { %793 = vmatprep.subr.msk.bf16.mxu1 %vm473_vm15, %v792_v34  ;;  %v611_v36 = vsel %vm473_vm15, %v791_v35, 0 }
 0x220   : > { %625 = vmatpush1.bf16.msra.mxu1 %v611_v36 }
 0x223   : > { %794 = vmatmul.mubr.msk.bf16.vlgmr.msra.gmra.mrb[0].mxu1 %vm606_vm3, %v545_v37 }
 0x2f6   : > { %v650_v39 = vpop.f32.mrb[0].mxu1 }
 0x2f7   : > { %v651_v40 = vadd.f32 %v650_v39, %v559_v38  ;;  %v652_v41 = vpop.f32.mrb[1].mxu1 }
 0x2f8   : > { %v653_v42 = vadd.f32 %v652_v41, %v559_v38  ;;  %v654_v43 = vpop.f32.mrb[2].mxu1 }
 0x2f9   : > { %v657_v44 = vmax.f32 %v651_v40, 0.0  ;;  %v655_v45 = vpop.f32.mrb[3].mxu1 }
 0x2fa   : > { %v658_v46 = vmax.f32 %v653_v42, 0.0 }
 0x2fc   : > { %v802_v47 = vpack.c.bf16 %v658_v46, %v657_v44 }
 0x2fe   : > { %667 = vst.msk [vmem:[#allocation5] sm:$0xff] %vm1090_vm5, %v802_v47 }
 0x305   : > { %v668_v48 = vld [vmem:[#allocation5] sm:$0xff] }
 0x306   : > { %670 = vrot.lane.b32.xlu1 %v668_v48, %s948_s13 }
 0x378   : > { %v671_v49 = vpop.permute.xlu1 %670 }
 0x379   : > { %v672_v50 = vrot.slane %v671_v49, 4 }
 0x37b   : > { %v673_v51 = vsel %vm253_vm9, %v671_v49, %v672_v50 }
 0x37c   : > { %v675_v52 = vmax.bf16 %v673_v51, %v668_v48 }
 0x37e   : > { %677 = vrot.lane.b32.xlu0 %v675_v52, %s947_s12  ;;  %s689_s12 = scalar_lea.sflag [#allocation7], %s216_s10 }
 0x3f0   : > { %v678_v53 = vpop.permute.xlu0 %677 }
 0x3f1   : > { %v679_v54 = vrot.slane %v678_v53, 4 }
 0x3f3   : > { %v680_v55 = vsel %vm289_vm7, %v678_v53, %v679_v54 }
 0x3f4   : > { %v682_v56 = vmax.bf16 %v680_v55, %v675_v52 }
 0x3f6   : > { %v683_v57 = vunpack.c.l.bf16 %v682_v56  ;;  %v684_v58 = vunpack.c.h.bf16 %v682_v56 }
 0x3f8   : > { %685 = vst [vmem:[%s218_s15] sm:$0xff] %v683_v57  ;;  %687 = vst.msk [vmem:[%s218_s15 + $0x8] sm:$0xff] %vm686_vm4, %v684_v58 }
 0x3f9   : > { %893 = shalt.err (!%p890_p3)
}
 0x3fa   : > { %s894_s6 = scalar_lea.hbm %s1147_s23, 256  ;;  %s898_s9 = scalar_lea.hbm %s1194_s5, 512 }
 0x3fb   : > { %p895_p4 = scmp.ne.s32.totalorder %s1147_s23, %s894_s6  ;;  %p899_p9 = scmp.lt.u32.totalorder %s1147_s23, %s1194_s5 }
 0x3fc   : > { %p900_p10 = scmp.lt.u32.totalorder %s898_s9, %s894_s6  ;;  %p902_p12 = scmp.lt.u32.totalorder %s894_s6, %s1147_s23 }
 0x3fd   : > { %p896_p7 = pnand %p895_p4, %p1023_p5 }
 0x3fe   : > { %p901_p11 = por %p900_p10, %p899_p9 }
 0x3ff   : > { %p897_p8 = pneg %p896_p7 }
 0x400   : > { %p903_p13 = por %p902_p12, %p901_p11 }
 0x402   : > { %p904_p0 = pnand %p903_p13, %p897_p8 }
 0x404   : > { %907 = shalt.err (!%p904_p0)
}
 0x405   : > { %804 = dma.vmem_to_hbm [thread:$0]  (%p1023_p5), %s1149_s16, 256, %s1147_s23, %s689_s12  }
 0x406 PF: > { %p810_p1 = scmp.ge.s32.totalorder %s942_s21, 2  ;;  %s715_s14 = sand.u32 1, %s930_s18  }
 0x407   : > { %s716_s15 = scalar_lea.sflag [#allocation7], %s715_s14 }
 0x408   : > { %p807_p2 = pnand %p810_p1, %p1027_p6 }
 0x40a   : > { %925 = dma.done.wait (!%p807_p2), %s716_s15, 256  }
 0x40b   : > { %927 = vsyncadd (!%p807_p2), %s716_s15, 4294967040  ;;  %p15_p3 = scmp.ge.s32.totalorder %s1010_s24, 4   ;;  %s1203_s18 = smov %s934_s19 }
 0x40c   : > { %s1204_s19 = smov %s938_s20  ;;  %s1205_s20 = smov %s1021_s27 }
 0x40d   : > { %s1206_s21 = smov %s1010_s24  ;;  %17 = sbr.rel (!%p15_p3) target bundleno = 3 (0x3), region = 75 }
 0x414   :  { %721 = vsyncpa [#allocation7], 1 }
 0x415   :  { %723 = vsyncpa [#allocation7 + $0x1], 1 }

</bundles_post_ra>
